<compile_context>
chip_gen: v7x
topology: tpu7x:2x2x1
jax: 0.10.0
libtpu: 0.0.40
codegen_flags: <defaults>
</compile_context>

<pallas_src>
import numpy as np
import jax
import jax.numpy as jnp
from jax.experimental import pallas as pl
from jax.experimental.pallas import tpu as pltpu


# Safe on v5e/v6e/v7x; raise toward ~100 MiB on v5e/v6e for very large N*B*C.
_VMEM_LIMIT = 64 * 1024 * 1024
# Single-buffer constant-index blocks (their index_map is (0, 0) at every grid
# step, so double-buffering only wastes VMEM).
_SINGLE = pl.Buffered(1)


def _round_up(v, m):
    return ((v + m - 1) // m) * m


def _pick_tiles(n):
    """Padded frequency length Np (tile multiple) and a row-tile that divides it."""
    if n >= 128:
        n_pad = _round_up(n, 128)
        for t in (512, 256, 128):
            # keep streamed (t, Np) DFT blocks modest (x2 matrices, double buffered)
            if n_pad % t == 0 and t * n_pad <= (1 << 20):
                return n_pad, t
        return n_pad, 128
    n_pad = _round_up(n, 8)
    return n_pad, n_pad


# ----------------------------------------------------------------------------
# Pass 1: forward orthonormal DFT (wide slab matmuls) + per-(freq,batch) energy
# ----------------------------------------------------------------------------
def _fwd_dft_kernel(fcos_ref, fsin_ref, x_ref, sel_ref,
                    xre_ref, xim_ref, energy_ref):
    x = x_ref[...]                                                # (Np, B*C)
    xre = jnp.dot(fcos_ref[...], x, preferred_element_type=jnp.float32)
    xim = jnp.dot(fsin_ref[...], x, preferred_element_type=jnp.float32)
    xre_ref[...] = xre.astype(xre_ref.dtype)                      # (tile, B*C)
    xim_ref[...] = xim.astype(xim_ref.dtype)
    sq = xre * xre + xim * xim                                    # f32
    # fold the C channels of every batch lane-chunk: (tile, B*C) @ (B*C, B).
    # (could be moved to an XLU cross-lane reduce if the MXU slot saturates)
    energy_ref[...] = jnp.dot(sq, sel_ref[...],
                              preferred_element_type=jnp.float32)  # (tile, B)


# ----------------------------------------------------------------------------
# Pass 2: mask + block-diag complex linear + relu/softshrink  ->  real(iDFT)
# ----------------------------------------------------------------------------
def _filter_idft_kernel(thr_ref, energy_ref, xre_ref, xim_ref, rep_ref,
                        br_ref, bi_ref, wr_ref, wi_ref, icos_ref, isin_ref,
                        o_ref, ore_s, oim_s):
    # Stage A (once, at the first output-row tile): masked spectrum, complex
    # linear, relu + softshrink -- stored lane-dense for ALL batches.
    @pl.when(pl.program_id(0) == 0)
    def _():
        thr = thr_ref[0, 0]
        # per-(freq, batch) energy broadcast to that batch's C channel lanes
        e_bc = jnp.dot(energy_ref[...], rep_ref[...],
                       preferred_element_type=jnp.float32)        # (Np, B*C)
        mask = (e_bc >= thr).astype(xre_ref.dtype)                # exact 0/1
        xre_m = xre_ref[...] * mask
        xim_m = xim_ref[...] * mask
        # o_re = xre@r1 - xim@i1 + rb1 ; o_im = xim@r1 + xre@i1 + ib1
        # (block-diagonal over batches; -lam is pre-folded into the bias)
        o_re = (jnp.dot(xre_m, wr_ref[...], preferred_element_type=jnp.float32)
                - jnp.dot(xim_m, wi_ref[...], preferred_element_type=jnp.float32)
                + br_ref[...])
        o_im = (jnp.dot(xim_m, wr_ref[...], preferred_element_type=jnp.float32)
                + jnp.dot(xre_m, wi_ref[...], preferred_element_type=jnp.float32)
                + bi_ref[...])
        # relu followed by softshrink(lam >= 0)  ==  max(z - lam, 0)
        ore_s[...] = jnp.maximum(o_re, 0.0).astype(ore_s.dtype)   # (Np, B*D)
        oim_s[...] = jnp.maximum(o_im, 0.0).astype(oim_s.dtype)

    # Stage B (every row tile): real part of the inverse orthonormal DFT.
    # icos == fcos and isin == -fsin, so the forward matrices are reused.
    o_ref[...] = (
        jnp.dot(icos_ref[...], ore_s[...], preferred_element_type=jnp.float32)
        + jnp.dot(isin_ref[...], oim_s[...], preferred_element_type=jnp.float32))


def global_local_filtering(x, r1, i1, rb1, ib1, threshold_param=0.3,
                           sparsity_threshold=0.01,
                           compute_dtype=jnp.float32):
    """Pallas TPU forward of Global_Local_Filtering.

    compute_dtype=jnp.bfloat16 runs the MXU matmuls in bf16 with f32
    accumulation (the fast path on v6e / v7x, ~1e-2 relative accuracy).
    """
    B, N, C = x.shape
    D = r1.shape[1]
    BC, BD = B * C, B * D
    cdt = compute_dtype
    f32 = jnp.float32

    Np, tile = _pick_tiles(N)

    # --- orthonormal DFT matrices (host constants), zero-padded to (Np, Np).
    #     The inverse transform reuses them (icos == fcos, isin == -fsin); the
    #     zero pad rows/cols make padded frequencies/time-steps contribute 0.
    nn = np.arange(N)
    ang = 2.0 * np.pi * np.outer(nn, nn) / N
    s = 1.0 / np.sqrt(N)
    fcos_np = np.zeros((Np, Np), np.float32)
    fsin_np = np.zeros((Np, Np), np.float32)
    fcos_np[:N, :N] = np.cos(ang) * s
    fsin_np[:N, :N] = -np.sin(ang) * s
    fcos = jnp.asarray(fcos_np, cdt)
    fsin = jnp.asarray(fsin_np, cdt)

    # --- tiny constants: channel selectors, block-diag weights, folded bias
    eye_b = jnp.eye(B, dtype=f32)
    sel = jnp.kron(eye_b, jnp.ones((C, 1), f32))                  # (B*C, B)
    rep = jnp.kron(eye_b, jnp.ones((1, C), f32))                  # (B, B*C)
    wr = jnp.kron(eye_b, r1.astype(f32)).astype(cdt)              # (B*C, B*D)
    wi = jnp.kron(eye_b, i1.astype(f32)).astype(cdt)              # (B*C, B*D)
    lam = jnp.asarray(sparsity_threshold, f32)
    br = (jnp.tile(rb1.astype(f32), B) - lam).reshape(1, BD)      # (1, B*D)
    bi = (jnp.tile(ib1.astype(f32), B) - lam).reshape(1, BD)

    # --- layout plumbing: sequence axis in rows, (batch, channel) in lanes
    x_slab = jnp.transpose(x, (1, 0, 2)).reshape(N, BC).astype(cdt)
    if Np != N:
        x_slab = jnp.pad(x_slab, ((0, Np - N), (0, 0)))

    # ---------------- pass 1: forward DFT + spectral energy ----------------
    xre, xim, energy = pl.pallas_call(
        _fwd_dft_kernel,
        grid=(Np // tile,),
        in_specs=[
            pl.BlockSpec((tile, Np), lambda i: (i, 0)),                       # fcos (streamed)
            pl.BlockSpec((tile, Np), lambda i: (i, 0)),                       # fsin (streamed)
            pl.BlockSpec((Np, BC), lambda i: (0, 0), pipeline_mode=_SINGLE),  # x slab (resident)
            pl.BlockSpec((BC, B), lambda i: (0, 0), pipeline_mode=_SINGLE),   # channel selector
        ],
        out_specs=[
            pl.BlockSpec((tile, BC), lambda i: (i, 0)),
            pl.BlockSpec((tile, BC), lambda i: (i, 0)),
            pl.BlockSpec((tile, B), lambda i: (i, 0)),
        ],
        out_shape=(jax.ShapeDtypeStruct((Np, BC), cdt),
                   jax.ShapeDtypeStruct((Np, BC), cdt),
                   jax.ShapeDtypeStruct((Np, B), f32)),
        compiler_params=pltpu.CompilerParams(
            dimension_semantics=("parallel",),
            vmem_limit_bytes=_VMEM_LIMIT),
    )(fcos, fsin, x_slab, sel)

    # global mean over the (B, N) energies -> one scalar threshold (divide-free
    # mask).  Padded rows are exactly zero so summing all Np rows is exact.
    thr = (threshold_param * (jnp.sum(energy) / (N * B) + 1e-6))
    thr = thr.astype(f32).reshape(1, 1)

    # ------ pass 2: mask + complex linear + relu/shrink + real(iDFT) ------
    # Output-row axis is "arbitrary": stage A fills the scratch at step 0.
    # TODO(synk): for v7x megacore, add a second "parallel" batch-group axis
    # once B*C is large enough for 128-lane sub-blocks per group.
    y_slab = pl.pallas_call(
        _filter_idft_kernel,
        grid=(Np // tile,),
        in_specs=[
            pl.BlockSpec(memory_space=pltpu.MemorySpace.SMEM),                 # thr scalar
            pl.BlockSpec((Np, B), lambda i: (0, 0), pipeline_mode=_SINGLE),    # energy
            pl.BlockSpec((Np, BC), lambda i: (0, 0), pipeline_mode=_SINGLE),   # xre slab
            pl.BlockSpec((Np, BC), lambda i: (0, 0), pipeline_mode=_SINGLE),   # xim slab
            pl.BlockSpec((B, BC), lambda i: (0, 0), pipeline_mode=_SINGLE),    # mask broadcaster
            pl.BlockSpec((1, BD), lambda i: (0, 0), pipeline_mode=_SINGLE),    # rb1 - lam (tiled)
            pl.BlockSpec((1, BD), lambda i: (0, 0), pipeline_mode=_SINGLE),    # ib1 - lam (tiled)
            pl.BlockSpec((BC, BD), lambda i: (0, 0), pipeline_mode=_SINGLE),   # blockdiag(r1)
            pl.BlockSpec((BC, BD), lambda i: (0, 0), pipeline_mode=_SINGLE),   # blockdiag(i1)
            pl.BlockSpec((tile, Np), lambda i: (i, 0)),                        # icos == fcos (streamed)
            pl.BlockSpec((tile, Np), lambda i: (i, 0)),                        # isin == fsin (streamed)
        ],
        out_specs=pl.BlockSpec((tile, BD), lambda i: (i, 0)),
        out_shape=jax.ShapeDtypeStruct((Np, BD), f32),
        scratch_shapes=[pltpu.VMEM((Np, BD), cdt),
                        pltpu.VMEM((Np, BD), cdt)],
        compiler_params=pltpu.CompilerParams(
            dimension_semantics=("arbitrary",),
            vmem_limit_bytes=_VMEM_LIMIT),
    )(thr, energy, xre, xim, rep, br, bi, wr, wi, fcos, fsin)

    # layout plumbing back to (B, N, D)
    y = y_slab[:N].reshape(N, B, D)
    return jnp.transpose(y, (1, 0, 2))


# ----------------------------------------------------------------------------
# Pure-numpy reference (mirrors the PyTorch module).
# ----------------------------------------------------------------------------
def _reference_numpy(x, r1, i1, rb1, ib1, threshold_param=0.3, lam=0.01):
    x = np.asarray(x, np.float64)
    r1 = np.asarray(r1, np.float64)
    i1 = np.asarray(i1, np.float64)
    rb1 = np.asarray(rb1, np.float64)
    ib1 = np.asarray(ib1, np.float64)
    xf = np.fft.fft(x, axis=1, norm='ortho')
    energy = np.sum(np.abs(xf) ** 2, axis=-1)
    mask = (energy / (energy.mean() + 1e-6) >= threshold_param).astype(np.float64)
    xf = xf * mask[..., None]
    o_re = (np.einsum('bnc,cd->bnd', xf.real, r1)
            - np.einsum('bnc,cd->bnd', xf.imag, i1) + rb1)
    o_im = (np.einsum('bnc,cd->bnd', xf.imag, r1)
            + np.einsum('bnc,cd->bnd', xf.real, i1) + ib1)

    def softshrink(v):
        return np.where(v > lam, v - lam, np.where(v < -lam, v + lam, 0.0))

    o_re = softshrink(np.maximum(o_re, 0.0))
    o_im = softshrink(np.maximum(o_im, 0.0))
    y = np.fft.ifft(o_re + 1j * o_im, axis=1, norm='ortho')
    return y.real


if __name__ == "__main__":
    B, N, C, D = 2, 8, 4, 8           # batch, seq, input_dim, output_dim
    scale = 0.02

    key = jax.random.PRNGKey(0)
    kx, kr1, ki1, krb, kib, kx2 = jax.random.split(key, 6)
    x = jax.random.normal(kx, (B, N, C), dtype=jnp.float32)
    r1 = scale * jax.random.normal(kr1, (C, D), dtype=jnp.float32)
    i1 = scale * jax.random.normal(ki1, (C, D), dtype=jnp.float32)
    rb1 = scale * jax.random.normal(krb, (D,), dtype=jnp.float32)
    ib1 = scale * jax.random.normal(kib, (D,), dtype=jnp.float32)

    # --- f32 path (bit-safe) vs float64 numpy reference -----------------
    y = jax.block_until_ready(global_local_filtering(x, r1, i1, rb1, ib1))
    y_ref = _reference_numpy(x, r1, i1, rb1, ib1)
    np.testing.assert_allclose(np.asarray(y), y_ref, rtol=1e-3, atol=1e-3)

    # --- multi-tile path (several output-row grid steps, N = 1024) ------
    x_big = jax.random.normal(kx2, (B, 1024, C), dtype=jnp.float32)
    y_big = jax.block_until_ready(global_local_filtering(x_big, r1, i1, rb1, ib1))
    y_big_ref = _reference_numpy(x_big, r1, i1, rb1, ib1)
    np.testing.assert_allclose(np.asarray(y_big), y_big_ref, rtol=1e-3, atol=1e-3)

    # --- bf16 fast path (v6e/v7x MXU-native) : compile/run smoke check --
    y_bf = jax.block_until_ready(
        global_local_filtering(x, r1, i1, rb1, ib1, compute_dtype=jnp.bfloat16))
    assert y_bf.shape == y_ref.shape
    assert bool(jnp.all(jnp.isfinite(y_bf)))

    print("KERNEL_OK")
</pallas_src>

<mosaic_0001>
module attributes {stable_mosaic.version = 11 : i64} {
  func.func @_fwd_dft_kernel(%arg0: i32, %arg1: memref<8x8xf32, #tpu.memory_space<vmem>>, %arg2: memref<8x8xf32, #tpu.memory_space<vmem>>, %arg3: memref<8x8xf32, #tpu.memory_space<vmem>>, %arg4: memref<8x2xf32, #tpu.memory_space<vmem>>, %arg5: memref<8x8xf32, #tpu.memory_space<vmem>>, %arg6: memref<8x8xf32, #tpu.memory_space<vmem>>, %arg7: memref<8x2xf32, #tpu.memory_space<vmem>>) attributes {dimension_semantics = [#tpu.dimension_semantics<parallel>], iteration_bounds = array<i64: 1>, scalar_prefetch = 0 : i64, scratch_operands = 0 : i64, tpu.core_type = #tpu.core_type<tc>, window_params = [{transform_indices = @transform_0, window_bounds = array<i64: 8, 8>}, {transform_indices = @transform_1, window_bounds = array<i64: 8, 8>}, {pipeline_mode = #tpu.pipeline_mode<synchronous>, transform_indices = @transform_2, window_bounds = array<i64: 8, 8>}, {pipeline_mode = #tpu.pipeline_mode<synchronous>, transform_indices = @transform_3, window_bounds = array<i64: 8, 2>}, {transform_indices = @transform_4, window_bounds = array<i64: 8, 8>}, {transform_indices = @transform_5, window_bounds = array<i64: 8, 8>}, {transform_indices = @transform_6, window_bounds = array<i64: 8, 2>}]} {
    %c0 = arith.constant 0 : index
    %c0_0 = arith.constant 0 : index
    %0 = vector.load %arg3[%c0, %c0_0] : memref<8x8xf32, #tpu.memory_space<vmem>>, vector<8x8xf32>
    %c0_1 = arith.constant 0 : index
    %c0_2 = arith.constant 0 : index
    %1 = vector.load %arg1[%c0_1, %c0_2] : memref<8x8xf32, #tpu.memory_space<vmem>>, vector<8x8xf32>
    %cst = arith.constant dense<0.000000e+00> : vector<8x8xf32>
    %2 = tpu.matmul %1, %0, %cst {dimension_numbers = #tpu.dot_dimension_numbers<[1], [0], [0], [1], [0, 0, 1, 1], [], []>} : vector<8x8xf32>, vector<8x8xf32>, vector<8x8xf32> -> vector<8x8xf32>
    %c0_3 = arith.constant 0 : index
    %c0_4 = arith.constant 0 : index
    %3 = vector.load %arg2[%c0_3, %c0_4] : memref<8x8xf32, #tpu.memory_space<vmem>>, vector<8x8xf32>
    %cst_5 = arith.constant dense<0.000000e+00> : vector<8x8xf32>
    %4 = tpu.matmul %3, %0, %cst_5 {dimension_numbers = #tpu.dot_dimension_numbers<[1], [0], [0], [1], [0, 0, 1, 1], [], []>} : vector<8x8xf32>, vector<8x8xf32>, vector<8x8xf32> -> vector<8x8xf32>
    %c0_6 = arith.constant 0 : index
    %c0_7 = arith.constant 0 : index
    %5 = vector.load %arg5[%c0_6, %c0_7] : memref<8x8xf32, #tpu.memory_space<vmem>>, vector<8x8xf32>
    tpu.vector_store %arg5[%c0_6, %c0_7], %2 {strides = array<i32>} : memref<8x8xf32, #tpu.memory_space<vmem>>, vector<8x8xf32>,
    %c0_8 = arith.constant 0 : index
    %c0_9 = arith.constant 0 : index
    %6 = vector.load %arg6[%c0_8, %c0_9] : memref<8x8xf32, #tpu.memory_space<vmem>>, vector<8x8xf32>
    tpu.vector_store %arg6[%c0_8, %c0_9], %4 {strides = array<i32>} : memref<8x8xf32, #tpu.memory_space<vmem>>, vector<8x8xf32>,
    %7 = arith.mulf %2, %2 : vector<8x8xf32>
    %8 = arith.mulf %4, %4 : vector<8x8xf32>
    %9 = arith.addf %7, %8 : vector<8x8xf32>
    %c0_10 = arith.constant 0 : index
    %c0_11 = arith.constant 0 : index
    %10 = vector.load %arg4[%c0_10, %c0_11] : memref<8x2xf32, #tpu.memory_space<vmem>>, vector<8x2xf32>
    %cst_12 = arith.constant dense<0.000000e+00> : vector<8x2xf32>
    %11 = tpu.matmul %9, %10, %cst_12 {dimension_numbers = #tpu.dot_dimension_numbers<[1], [0], [0], [1], [0, 0, 1, 1], [], []>} : vector<8x8xf32>, vector<8x2xf32>, vector<8x2xf32> -> vector<8x2xf32>
    %c0_13 = arith.constant 0 : index
    %c0_14 = arith.constant 0 : index
    %12 = vector.load %arg7[%c0_13, %c0_14] : memref<8x2xf32, #tpu.memory_space<vmem>>, vector<8x2xf32>
    tpu.vector_store %arg7[%c0_13, %c0_14], %11 {strides = array<i32>} : memref<8x2xf32, #tpu.memory_space<vmem>>, vector<8x2xf32>,
    return
  }
  func.func @transform_0(%arg0: i32) -> (i32, i32) {
    %c0_i32 = arith.constant 0 : i32
    %c0_i32_0 = arith.constant 0 : i32
    return %arg0, %c0_i32 : i32, i32
  }
  func.func @transform_1(%arg0: i32) -> (i32, i32) {
    %c0_i32 = arith.constant 0 : i32
    %c0_i32_0 = arith.constant 0 : i32
    return %arg0, %c0_i32 : i32, i32
  }
  func.func @transform_2(%arg0: i32) -> (i32, i32) {
    %c0_i32 = arith.constant 0 : i32
    %c0_i32_0 = arith.constant 0 : i32
    %c0_i32_1 = arith.constant 0 : i32
    return %c0_i32, %c0_i32_0 : i32, i32
  }
  func.func @transform_3(%arg0: i32) -> (i32, i32) {
    %c0_i32 = arith.constant 0 : i32
    %c0_i32_0 = arith.constant 0 : i32
    %c0_i32_1 = arith.constant 0 : i32
    return %c0_i32, %c0_i32_0 : i32, i32
  }
  func.func @transform_4(%arg0: i32) -> (i32, i32) {
    %c0_i32 = arith.constant 0 : i32
    %c0_i32_0 = arith.constant 0 : i32
    return %arg0, %c0_i32 : i32, i32
  }
  func.func @transform_5(%arg0: i32) -> (i32, i32) {
    %c0_i32 = arith.constant 0 : i32
    %c0_i32_0 = arith.constant 0 : i32
    return %arg0, %c0_i32 : i32, i32
  }
  func.func @transform_6(%arg0: i32) -> (i32, i32) {
    %c0_i32 = arith.constant 0 : i32
    %c0_i32_0 = arith.constant 0 : i32
    return %arg0, %c0_i32 : i32, i32
  }
}

</mosaic_0001>

<bundles_post_ra>
// kernel: tpu_custom_call.1
= control target key start
LH: loop header
LB: loop body
LE: loop exit
PB: predicated region body
PF: predicated region fallthrough
CT: control target
= control target key end

     0   :  { %12 = vsyncpa [#allocation3], 0  ;;  %s674_s0 = inlined_call_operand.hbm [shape: f32[8,8], index: 0, kind: input, shape index: {}]   ;;  %s675_s1 = inlined_call_operand.hbm [shape: f32[8,8], index: 1, kind: input, shape index: {}]   ;;  %s676_s2 = inlined_call_operand.hbm [shape: f32[8,8], index: 2, kind: input, shape index: {}]   ;;  %s677_s3 = inlined_call_operand.hbm [shape: f32[8,2], index: 3, kind: input, shape index: {}]   ;;  %s678_s4 = inlined_call_operand.hbm [shape: f32[8,8], index: 4, kind: output, shape index: {0}]   ;;  %s679_s5 = inlined_call_operand.hbm [shape: f32[8,8], index: 5, kind: output, shape index: {1}]   ;;  %s680_s6 = inlined_call_operand.hbm [shape: f32[8,2], index: 6, kind: output, shape index: {2}]  }
   0x1   :  { %13 = vsyncpa [#allocation6], 0 }
   0x2   :  { %14 = vsyncpa [#allocation9], 0 }
   0x3   :  { %15 = vsyncpa [#allocation4], 0 }
   0x4   :  { %16 = vsyncpa [#allocation12], 0  ;;  %s541_s21 = smov [#allocation5]   ;;  %s542_s23 = smov [#allocation2]  }
   0x5   :  { %s33_s22 = sshll.u32 %s541_s21, 4  ;;  %s23_s24 = sshll.u32 %s542_s23, 4  ;;  %s34_s22 = int_to_ptr.vmem [resolvable:$true] %s33_s22  ;;  %s24_s24 = int_to_ptr.vmem [resolvable:$true] %s23_s24 }
   0x6   :  { %s377_s27 = scalar_lea.hbm %s675_s1, 128 }
   0x7   :  { %p378_p0 = scmp.ne.s32.totalorder %s675_s1, %s377_s27  ;;  %p381_p1 = scmp.lt.u32.totalorder %s377_s27, %s675_s1 }
   0x9   :  { %p383_p2 = pnand %p381_p1, %p378_p0 }
   0xb   :  { %386 = shalt.err (!%p383_p2)
}
   0xc   :  { %s387_s8 = scalar_lea.vmem %s34_s22, 128  ;;  %p392_p4 = scmp.lt.s32.totalorder %s34_s22, %s34_s22 }
   0xd   :  { %p388_p3 = scmp.ne.s32.totalorder %s34_s22, %s387_s8  ;;  %p393_p5 = scmp.lt.s32.totalorder %s387_s8, %s387_s8 }
   0xf   :  { %p394_p6 = por %p393_p5, %p392_p4 }
  0x11   :  { %p395_p7 = pnand %p394_p6, %p388_p3 }
  0x13   :  { %398 = shalt.err (!%p395_p7)
}
  0x14   :  { %36 = dma.hbm_to_vmem [thread:$0]  %s675_s1, 128, %s34_s22, [#allocation6]  }
  0x15   :  { %s399_s13 = scalar_lea.hbm %s674_s0, 128 }
  0x16   :  { %p400_p8 = scmp.ne.s32.totalorder %s674_s0, %s399_s13  ;;  %p403_p9 = scmp.lt.u32.totalorder %s399_s13, %s674_s0 }
  0x18   :  { %p405_p10 = pnand %p403_p9, %p400_p8 }
  0x1a   :  { %408 = shalt.err (!%p405_p10)
}
  0x1b   :  { %s409_s18 = scalar_lea.vmem %s24_s24, 128  ;;  %p414_p12 = scmp.lt.s32.totalorder %s24_s24, %s24_s24 }
  0x1c   :  { %p410_p11 = scmp.ne.s32.totalorder %s24_s24, %s409_s18  ;;  %p415_p13 = scmp.lt.s32.totalorder %s409_s18, %s409_s18 }
  0x1e   :  { %p416_p0 = por %p415_p13, %p414_p12 }
  0x20   :  { %p417_p1 = pnand %p416_p0, %p410_p11 }
  0x22   :  { %420 = shalt.err (!%p417_p1)
}
  0x23   :  { %26 = dma.hbm_to_vmem [thread:$0]  %s674_s0, 128, %s24_s24, [#allocation3]  }
  0x24   :  { %s543_s20 = smov [#allocation7]   ;;  %s544_s22 = smov [#allocation8]  }
  0x25   :  { %s43_s21 = sshll.u32 %s543_s20, 4  ;;  %s53_s23 = sshll.u32 %s544_s22, 4  ;;  %s44_s21 = int_to_ptr.vmem [resolvable:$true] %s43_s21  ;;  %s54_s23 = int_to_ptr.vmem [resolvable:$true] %s53_s23 }
  0x26   :  { %s421_s27 = scalar_lea.hbm %s676_s2, 128 }
  0x27   :  { %p422_p2 = scmp.ne.s32.totalorder %s676_s2, %s421_s27  ;;  %p425_p3 = scmp.lt.u32.totalorder %s421_s27, %s676_s2 }
  0x29   :  { %p427_p4 = pnand %p425_p3, %p422_p2 }
  0x2b   :  { %430 = shalt.err (!%p427_p4)
}
  0x2c   :  { %s431_s0 = scalar_lea.vmem %s44_s21, 128  ;;  %p436_p6 = scmp.lt.s32.totalorder %s44_s21, %s44_s21 }
  0x2d   :  { %p432_p5 = scmp.ne.s32.totalorder %s44_s21, %s431_s0  ;;  %p437_p7 = scmp.lt.s32.totalorder %s431_s0, %s431_s0 }
  0x2f   :  { %p438_p8 = por %p437_p7, %p436_p6 }
  0x31   :  { %p439_p9 = pnand %p438_p8, %p432_p5 }
  0x33   :  { %442 = shalt.err (!%p439_p9)
}
  0x34   :  { %46 = dma.hbm_to_vmem [thread:$0]  %s676_s2, 128, %s44_s21, [#allocation6]  }
  0x35   :  { %s443_s11 = scalar_lea.hbm %s677_s3, 128 }
  0x36   :  { %p444_p10 = scmp.ne.s32.totalorder %s677_s3, %s443_s11  ;;  %p447_p11 = scmp.lt.u32.totalorder %s443_s11, %s677_s3 }
  0x38   :  { %p449_p12 = pnand %p447_p11, %p444_p10 }
  0x3a   :  { %452 = shalt.err (!%p449_p12)
}
  0x3b   :  { %s453_s16 = scalar_lea.vmem %s54_s23, 128  ;;  %p458_p0 = scmp.lt.s32.totalorder %s54_s23, %s54_s23 }
  0x3c   :  { %p454_p13 = scmp.ne.s32.totalorder %s54_s23, %s453_s16  ;;  %p459_p1 = scmp.lt.s32.totalorder %s453_s16, %s453_s16 }
  0x3e   :  { %p460_p2 = por %p459_p1, %p458_p0 }
  0x40   :  { %p461_p3 = pnand %p460_p2, %p454_p13 }
  0x42   :  { %464 = shalt.err (!%p461_p3)
}
  0x43   :  { %56 = dma.hbm_to_vmem [thread:$0]  %s677_s3, 128, %s54_s23, [#allocation9]  }
  0x44   :  { %531 = dma.done.wait [#allocation3], 128  }
  0x45   :  { %532 = vsyncadd [#allocation3], 4294967168 }
  0x46   :  { %533 = dma.done.wait [#allocation6], 256  }
  0x47   :  { %534 = vsyncadd [#allocation6], 4294967040 }
  0x48   :  { %535 = dma.done.wait [#allocation9], 128  }
  0x49   :  { %536 = vsyncadd [#allocation9], 4294967168  ;;  %v545_v0 = vmov 0.0   ;;  %vm546_vm0 = vmmov 0   ;;  %vm71_vm1 = vcmask 64512   ;;  %v69_v1 = vld [vmem:[#allocation7] sm:$0xff] }
  0x4a   :  { %353 = vmatprep.subr.mxu0 %v545_v0  ;;  %358 = vmatprep.subr.mxu1 %v545_v0  ;;  %v70_v2 = vld [vmem:[#allocation2] sm:$0xff]  ;;  %v145_v3 = vld [vmem:[#allocation5] sm:$0xff]  ;;  %v224_v4 = vld [vmem:[#allocation8] sm:$0xff]  ;;  %s547_s3 = smov [#allocation11]   ;;  %s548_s1 = smov [#allocation10]  }
  0x4b   :  { %355 = vmatprep.mubr.msk.f32.mxu0 %vm546_vm0, %v545_v0  ;;  %360 = vmatprep.mubr.msk.f32.mxu1 %vm546_vm0, %v545_v0  ;;  %s316_s18 = sshll.u32 %s547_s3, 4  ;;  %s306_s19 = sshll.u32 %s548_s1, 4  ;;  %s317_s18 = int_to_ptr.vmem [resolvable:$true] %s316_s18  ;;  %s307_s19 = int_to_ptr.vmem [resolvable:$true] %s306_s19 }
  0x4c   :  { %354 = vmatpush3.msra.mxu0 %v69_v1  ;;  %359 = vmatpush3.msra.mxu1 %v69_v1  ;;  %s465_s20 = scalar_lea.vmem %s317_s18, 128  ;;  %p470_p5 = scmp.lt.s32.totalorder %s317_s18, %s317_s18 }
  0x4d   :  { %356 = vmatmul.mubr.msk.f32.vlgmr.msra.gmra.mrb[0].mxu0 %vm71_vm1, %v70_v2  ;;  %361 = vmatmul.mubr.msk.f32.vlgmr.msra.gmra.mrb[0].mxu1 %vm71_vm1, %v145_v3  ;;  %p466_p4 = scmp.ne.s32.totalorder %s317_s18, %s465_s20  ;;  %p471_p6 = scmp.lt.s32.totalorder %s465_s20, %s465_s20 }
  0x4e   :  { %363 = vmatprep.subr.mxu0 %v545_v0  ;;  %365 = vmatprep.mubr.msk.f32.mxu0 %vm546_vm0, %v545_v0 }
  0x4f   :  { %364 = vmatpush3.msra.mxu0 %v224_v4  ;;  %p472_p7 = por %p471_p6, %p470_p5 }
  0x51   :  { %p473_p8 = pnand %p472_p7, %p466_p4 }
 0x120   :  { %v141_v5 = vpop.f32.mrb[0].mxu0  ;;  %v215_v6 = vpop.f32.mrb[0].mxu1 }
 0x121   :  { %v221_v7 = vmul.f32 %v141_v5, %v141_v5  ;;  %219 = vst.msk [vmem:[#allocation10] sm:$0xff] %vm71_vm1, %v141_v5  ;;  %v222_v8 = vmul.f32 %v215_v6, %v215_v6  ;;  %220 = vst.msk [vmem:[#allocation11] sm:$0xff] %vm71_vm1, %v215_v6  ;;  %v357_v9 = vpop.f32.mrb[1].mxu0  ;;  %v362_v10 = vpop.f32.mrb[1].mxu1 }
 0x123   :  { %v223_v11 = vadd.f32 %v222_v8, %v221_v7 }
 0x125   :  { %366 = vmatmul.mubr.msk.f32.vlgmr.msra.gmra.mrb[2].mxu0 %vm71_vm1, %v223_v11 }
 0x126   :  { %476 = shalt.err (!%p473_p8)
}
 0x127   :  { %s477_s23 = scalar_lea.hbm %s679_s5, 128 }
 0x128   :  { %p478_p9 = scmp.ne.s32.totalorder %s679_s5, %s477_s23  ;;  %p481_p10 = scmp.lt.u32.totalorder %s477_s23, %s679_s5 }
 0x12a   :  { %p483_p11 = pnand %p481_p10, %p478_p9 }
 0x12c   :  { %486 = shalt.err (!%p483_p11)
}
 0x12d   :  { %319 = dma.vmem_to_hbm [thread:$0]  %s317_s18, 128, %s679_s5, [#allocation12]  }
 0x12e   :  { %s487_s7 = scalar_lea.vmem %s307_s19, 128  ;;  %p492_p13 = scmp.lt.s32.totalorder %s307_s19, %s307_s19 }
 0x12f   :  { %p488_p12 = scmp.ne.s32.totalorder %s307_s19, %s487_s7  ;;  %p493_p0 = scmp.lt.s32.totalorder %s487_s7, %s487_s7 }
 0x131   :  { %p494_p1 = por %p493_p0, %p492_p13 }
 0x133   :  { %p495_p2 = pnand %p494_p1, %p488_p12 }
 0x135   :  { %498 = shalt.err (!%p495_p2)
}
 0x136   :  { %s499_s8 = scalar_lea.hbm %s678_s4, 128 }
 0x137   :  { %p500_p3 = scmp.ne.s32.totalorder %s678_s4, %s499_s8  ;;  %p503_p4 = scmp.lt.u32.totalorder %s499_s8, %s678_s4 }
 0x139   :  { %p505_p5 = pnand %p503_p4, %p500_p3 }
 0x13b   :  { %508 = shalt.err (!%p505_p5)
}
 0x13c   :  { %309 = dma.vmem_to_hbm [thread:$0]  %s307_s19, 128, %s678_s4, [#allocation4]   ;;  %vm298_vm2 = vcmask 15360  }
 0x13d   :  { %s549_s14 = smov [#allocation13]  }
 0x13e   :  { %s326_s15 = sshll.u32 %s549_s14, 4  ;;  %s327_s15 = int_to_ptr.vmem [resolvable:$true] %s326_s15 }
 0x13f   :  { %s509_s16 = scalar_lea.vmem %s327_s15, 128  ;;  %p514_p7 = scmp.lt.s32.totalorder %s327_s15, %s327_s15 }
 0x140   :  { %p510_p6 = scmp.ne.s32.totalorder %s327_s15, %s509_s16  ;;  %p515_p8 = scmp.lt.s32.totalorder %s509_s16, %s509_s16 }
 0x142   :  { %p516_p9 = por %p515_p8, %p514_p7 }
 0x144   :  { %p517_p10 = pnand %p516_p9, %p510_p6 }
 0x1f8   :  { %v294_v12 = vpop.f32.mrb[2].mxu0 }
 0x1f9   :  { %299 = vst.msk [vmem:[#allocation13] sm:$0xff] %vm298_vm2, %v294_v12  ;;  %v367_v13 = vpop.f32.mrb[3].mxu0 }
 0x1fa   :  { %520 = shalt.err (!%p517_p10)
}
 0x1fb   :  { %s521_s3 = scalar_lea.hbm %s680_s6, 128 }
 0x1fc   :  { %p522_p11 = scmp.ne.s32.totalorder %s680_s6, %s521_s3  ;;  %p525_p12 = scmp.lt.u32.totalorder %s521_s3, %s680_s6 }
 0x1fe   :  { %p527_p13 = pnand %p525_p12, %p522_p11 }
 0x200   :  { %530 = shalt.err (!%p527_p13)
}
 0x201   :  { %329 = dma.vmem_to_hbm [thread:$0]  %s327_s15, 128, %s680_s6, [#allocation12]  }
 0x202   :  { %537 = dma.done.wait [#allocation4], 128  }
 0x203   :  { %538 = vsyncadd [#allocation4], 4294967168 }
 0x204   :  { %539 = dma.done.wait [#allocation12], 256  }
 0x205   :  { %540 = vsyncadd [#allocation12], 4294967040 }
 0x206   :  { %339 = vsyncpa [#allocation3], 1 }
 0x207   :  { %340 = vsyncpa [#allocation6], 1 }
 0x208   :  { %341 = vsyncpa [#allocation9], 1 }
 0x209   :  { %342 = vsyncpa [#allocation4], 1 }
 0x20a   :  { %343 = vsyncpa [#allocation12], 1 }

</bundles_post_ra>
